<compile_context>
chip_gen: v5e
topology: v5e:2x2
jax: 0.10.0
libtpu: 0.0.40
codegen_flags: <defaults>
</compile_context>

<pallas_src>
import functools

import jax
import jax.numpy as jnp
from jax.experimental import pallas as pl
from jax.experimental.pallas import tpu as pltpu


def _relation_kernel(out_size, hidden, num_classes,
                     cvT_ref, q_ref, mstack_ref, wflat_ref, b_ref,
                     out_ref, bd_ref):
    """Fused Relation forward, 3 MXU ops, no in-kernel transposes.

    cvT_ref    : (H, C)        class vectors, pre-transposed
    q_ref      : (Q, H)        query encodings
    mstack_ref : (H, S*H)      M_stack[h1, s*H + h0] = M[h0, h1, s]
    wflat_ref  : (S*C, C)      W.weight.T (row s*C + c multiplies V[:, s*C + c])
    b_ref      : (1, C)        W bias
    out_ref    : (Q, C)        sigmoid probabilities
    bd_ref     : (S*H, S*C)    VMEM scratch: block-diagonal of cv^T
    """
    S, H, C = out_size, hidden, num_classes

    # ---- stage 0: block-diagonal cv^T in VMEM scratch (built once) --------
    bd_ref[...] = jnp.zeros_like(bd_ref)
    cv_t = cvT_ref[...].astype(jnp.float32)                  # (H, C)
    for s in range(S):                                       # S is small & static
        bd_ref[s * H:(s + 1) * H, s * C:(s + 1) * C] = cv_t

    # ---- stage 1: A = q @ M_stack  -> (Q, S*H)  (one MXU op) --------------
    a = jnp.dot(q_ref[...].astype(jnp.float32), mstack_ref[...].astype(jnp.float32),
                preferred_element_type=jnp.float32)

    # ---- stage 2: V = relu(A @ BD) -> (Q, S*C)  (one MXU op) --------------
    v = jnp.maximum(
        jnp.dot(a, bd_ref[...], preferred_element_type=jnp.float32), 0.0)

    # ---- stage 3: probs = sigmoid(V @ W_flat + b)  (one MXU op) -----------
    logits = jnp.dot(v, wflat_ref[...].astype(jnp.float32),
                     preferred_element_type=jnp.float32) + b_ref[...]
    out_ref[...] = jax.nn.sigmoid(logits)


def prepare_params(M, W_weight, W_bias):
    """One-time parameter layout prep (hoisted out of the forward path)."""
    H0, H1, S = M.shape
    C = W_weight.shape[0]
    # M_stack[h1, s*H0 + h0] = M[h0, h1, s]
    m_stack = jnp.transpose(M, (1, 2, 0)).reshape(H1, S * H0)
    # W.weight is (C, S*C) with column j = s*C + c_in; W_flat[j, :] = W.weight[:, j]
    w_flat = W_weight.T                                      # (S*C, C)
    b_2d = W_bias.reshape(1, C)
    return m_stack, w_flat, b_2d


@functools.partial(jax.jit, static_argnames=("out_size",))
def relation_forward(class_vector, query_encoder, m_stack, w_flat, b_2d, *, out_size):
    """Forward pass: one pallas_call on pre-laid-out parameters."""
    C, H = class_vector.shape
    Q = query_encoder.shape[0]
    S = out_size

    cv_t = class_vector.T                                    # tiny (H, C) per-call transpose

    kernel = functools.partial(_relation_kernel, S, H, C)
    return pl.pallas_call(
        kernel,
        out_shape=jax.ShapeDtypeStruct((Q, C), jnp.float32),
        in_specs=[
            pl.BlockSpec(memory_space=pltpu.MemorySpace.VMEM),  # cv^T
            pl.BlockSpec(memory_space=pltpu.MemorySpace.VMEM),  # q
            pl.BlockSpec(memory_space=pltpu.MemorySpace.VMEM),  # M_stack
            pl.BlockSpec(memory_space=pltpu.MemorySpace.VMEM),  # W_flat
            pl.BlockSpec(memory_space=pltpu.MemorySpace.VMEM),  # bias
        ],
        out_specs=pl.BlockSpec(memory_space=pltpu.MemorySpace.VMEM),
        scratch_shapes=[pltpu.VMEM((S * H, S * C), jnp.float32)],
    )(cv_t, query_encoder, m_stack, w_flat, b_2d)


def relation_reference(class_vector, query_encoder, M, W_weight, W_bias):
    """Pure-JAX reference mirroring the PyTorch code exactly."""
    out_size = M.shape[-1]
    mid = []
    for s in range(out_size):
        mid.append(class_vector @ M[:, :, s] @ query_encoder.T)   # (C, Q)
    mid = jnp.concatenate(mid, axis=0)                            # (S*C, Q)
    V = jax.nn.relu(mid.T)                                        # (Q, S*C)
    return jax.nn.sigmoid(V @ W_weight.T + W_bias)                # (Q, C)


if __name__ == "__main__":
    # Small shapes consistent with the module:
    #   C = number of classes, H = hidden dim, Q = number of queries
    C, H, out_size, Q = 4, 32, 8, 8

    key = jax.random.PRNGKey(0)
    k_m, k_w, k_b, k_cv, k_q = jax.random.split(key, 5)

    # Parameters (deterministic init, shapes per __init__)
    M = jax.random.normal(k_m, (H, H, out_size), dtype=jnp.float32)      # torch.randn
    fan_in, fan_out = C * out_size, C
    xavier_std = (2.0 / (fan_in + fan_out)) ** 0.5
    W_weight = xavier_std * jax.random.normal(k_w, (C, C * out_size), dtype=jnp.float32)
    bound = 1.0 / (fan_in ** 0.5)
    W_bias = jax.random.uniform(k_b, (C,), minval=-bound, maxval=bound, dtype=jnp.float32)

    # Inputs
    class_vector = jax.random.normal(k_cv, (C, H), dtype=jnp.float32)
    query_encoder = jax.random.normal(k_q, (Q, H), dtype=jnp.float32)

    # One-time parameter layout prep (constant across calls)
    m_stack, w_flat, b_2d = prepare_params(M, W_weight, W_bias)
    m_stack, w_flat, b_2d = jax.block_until_ready((m_stack, w_flat, b_2d))

    probs = relation_forward(class_vector, query_encoder, m_stack, w_flat, b_2d,
                             out_size=out_size)
    probs = jax.block_until_ready(probs)

    ref = relation_reference(class_vector, query_encoder, M, W_weight, W_bias)
    assert probs.shape == (Q, C)
    # Contraction order differs from the reference (h1 first vs h0 first), so
    # allow a few ulps of f32 accumulation noise.
    assert jnp.allclose(probs, ref, atol=5e-5, rtol=5e-5), "mismatch vs reference"

    print("KERNEL_OK")
</pallas_src>

<mosaic_0001>
module attributes {stable_mosaic.version = 11 : i64} {
  func.func @_relation_kernel(%arg0: memref<32x4xf32, #tpu.memory_space<vmem>>, %arg1: memref<8x32xf32, #tpu.memory_space<vmem>>, %arg2: memref<32x256xf32, #tpu.memory_space<vmem>>, %arg3: memref<32x4xf32, #tpu.memory_space<vmem>>, %arg4: memref<1x4xf32, #tpu.memory_space<vmem>>, %arg5: memref<8x4xf32, #tpu.memory_space<vmem>>, %arg6: memref<256x32xf32, #tpu.memory_space<vmem>>) attributes {dimension_semantics = [], scalar_prefetch = 0 : i64, scratch_operands = 1 : i64, tpu.core_type = #tpu.core_type<tc>} {
    %cst = arith.constant 0.000000e+00 : f32
    %0 = vector.broadcast %cst : f32 to vector<256x32xf32>
    %c0 = arith.constant 0 : index
    %c0_0 = arith.constant 0 : index
    %1 = vector.load %arg6[%c0, %c0_0] : memref<256x32xf32, #tpu.memory_space<vmem>>, vector<256x32xf32>
    tpu.vector_store %arg6[%c0, %c0_0], %0 {strides = array<i32>} : memref<256x32xf32, #tpu.memory_space<vmem>>, vector<256x32xf32>,
    %c0_1 = arith.constant 0 : index
    %c0_2 = arith.constant 0 : index
    %2 = vector.load %arg0[%c0_1, %c0_2] : memref<32x4xf32, #tpu.memory_space<vmem>>, vector<32x4xf32>
    %c0_3 = arith.constant 0 : index
    %c0_4 = arith.constant 0 : index
    %3 = vector.load %arg6[%c0_3, %c0_4] : memref<256x32xf32, #tpu.memory_space<vmem>>, vector<32x4xf32>
    tpu.vector_store %arg6[%c0_3, %c0_4], %2 {strides = array<i32>} : memref<256x32xf32, #tpu.memory_space<vmem>>, vector<32x4xf32>,
    %c32 = arith.constant 32 : index
    %c4 = arith.constant 4 : index
    %4 = vector.load %arg6[%c32, %c4] : memref<256x32xf32, #tpu.memory_space<vmem>>, vector<32x4xf32>
    tpu.vector_store %arg6[%c32, %c4], %2 {strides = array<i32>} : memref<256x32xf32, #tpu.memory_space<vmem>>, vector<32x4xf32>,
    %c64 = arith.constant 64 : index
    %c8 = arith.constant 8 : index
    %5 = vector.load %arg6[%c64, %c8] : memref<256x32xf32, #tpu.memory_space<vmem>>, vector<32x4xf32>
    tpu.vector_store %arg6[%c64, %c8], %2 {strides = array<i32>} : memref<256x32xf32, #tpu.memory_space<vmem>>, vector<32x4xf32>,
    %c96 = arith.constant 96 : index
    %c12 = arith.constant 12 : index
    %6 = vector.load %arg6[%c96, %c12] : memref<256x32xf32, #tpu.memory_space<vmem>>, vector<32x4xf32>
    tpu.vector_store %arg6[%c96, %c12], %2 {strides = array<i32>} : memref<256x32xf32, #tpu.memory_space<vmem>>, vector<32x4xf32>,
    %c128 = arith.constant 128 : index
    %c16 = arith.constant 16 : index
    %7 = vector.load %arg6[%c128, %c16] : memref<256x32xf32, #tpu.memory_space<vmem>>, vector<32x4xf32>
    tpu.vector_store %arg6[%c128, %c16], %2 {strides = array<i32>} : memref<256x32xf32, #tpu.memory_space<vmem>>, vector<32x4xf32>,
    %c160 = arith.constant 160 : index
    %c20 = arith.constant 20 : index
    %8 = vector.load %arg6[%c160, %c20] : memref<256x32xf32, #tpu.memory_space<vmem>>, vector<32x4xf32>
    tpu.vector_store %arg6[%c160, %c20], %2 {strides = array<i32>} : memref<256x32xf32, #tpu.memory_space<vmem>>, vector<32x4xf32>,
    %c192 = arith.constant 192 : index
    %c24 = arith.constant 24 : index
    %9 = vector.load %arg6[%c192, %c24] : memref<256x32xf32, #tpu.memory_space<vmem>>, vector<32x4xf32>
    tpu.vector_store %arg6[%c192, %c24], %2 {strides = array<i32>} : memref<256x32xf32, #tpu.memory_space<vmem>>, vector<32x4xf32>,
    %c224 = arith.constant 224 : index
    %c28 = arith.constant 28 : index
    %10 = vector.load %arg6[%c224, %c28] : memref<256x32xf32, #tpu.memory_space<vmem>>, vector<32x4xf32>
    tpu.vector_store %arg6[%c224, %c28], %2 {strides = array<i32>} : memref<256x32xf32, #tpu.memory_space<vmem>>, vector<32x4xf32>,
    %c0_5 = arith.constant 0 : index
    %c0_6 = arith.constant 0 : index
    %11 = vector.load %arg1[%c0_5, %c0_6] : memref<8x32xf32, #tpu.memory_space<vmem>>, vector<8x32xf32>
    %c0_7 = arith.constant 0 : index
    %c0_8 = arith.constant 0 : index
    %12 = vector.load %arg2[%c0_7, %c0_8] : memref<32x256xf32, #tpu.memory_space<vmem>>, vector<32x256xf32>
    %cst_9 = arith.constant dense<0.000000e+00> : vector<8x256xf32>
    %13 = tpu.matmul %11, %12, %cst_9 {dimension_numbers = #tpu.dot_dimension_numbers<[1], [0], [0], [1], [0, 0, 1, 1], [], []>} : vector<8x32xf32>, vector<32x256xf32>, vector<8x256xf32> -> vector<8x256xf32>
    %c0_10 = arith.constant 0 : index
    %c0_11 = arith.constant 0 : index
    %14 = vector.load %arg6[%c0_10, %c0_11] : memref<256x32xf32, #tpu.memory_space<vmem>>, vector<256x32xf32>
    %cst_12 = arith.constant dense<0.000000e+00> : vector<8x32xf32>
    %15 = tpu.matmul %13, %14, %cst_12 {dimension_numbers = #tpu.dot_dimension_numbers<[1], [0], [0], [1], [0, 0, 1, 1], [], []>} : vector<8x256xf32>, vector<256x32xf32>, vector<8x32xf32> -> vector<8x32xf32>
    %cst_13 = arith.constant 0.000000e+00 : f32
    %16 = vector.broadcast %cst_13 : f32 to vector<8x32xf32>
    %17 = arith.maximumf %15, %16 : vector<8x32xf32>
    %c0_14 = arith.constant 0 : index
    %c0_15 = arith.constant 0 : index
    %18 = vector.load %arg3[%c0_14, %c0_15] : memref<32x4xf32, #tpu.memory_space<vmem>>, vector<32x4xf32>
    %cst_16 = arith.constant dense<0.000000e+00> : vector<8x4xf32>
    %19 = tpu.matmul %17, %18, %cst_16 {dimension_numbers = #tpu.dot_dimension_numbers<[1], [0], [0], [1], [0, 0, 1, 1], [], []>} : vector<8x32xf32>, vector<32x4xf32>, vector<8x4xf32> -> vector<8x4xf32>
    %c0_17 = arith.constant 0 : index
    %c0_18 = arith.constant 0 : index
    %20 = vector.load %arg4[%c0_17, %c0_18] : memref<1x4xf32, #tpu.memory_space<vmem>>, vector<1x4xf32>
    %21 = vector.broadcast %20 : vector<1x4xf32> to vector<8x4xf32>
    %22 = arith.addf %19, %21 : vector<8x4xf32>
    %23 = arith.negf %22 : vector<8x4xf32>
    %24 = math.exp %23 : vector<8x4xf32>
    %cst_19 = arith.constant 1.000000e+00 : f32
    %25 = vector.broadcast %cst_19 : f32 to vector<8x4xf32>
    %26 = arith.addf %25, %24 : vector<8x4xf32>
    %27 = arith.divf %25, %26 : vector<8x4xf32>
    %c0_20 = arith.constant 0 : index
    %c0_21 = arith.constant 0 : index
    %28 = vector.load %arg5[%c0_20, %c0_21] : memref<8x4xf32, #tpu.memory_space<vmem>>, vector<8x4xf32>
    tpu.vector_store %arg5[%c0_20, %c0_21], %27 {strides = array<i32>} : memref<8x4xf32, #tpu.memory_space<vmem>>, vector<8x4xf32>,
    return
  }
}

</mosaic_0001>

<bundles_post_ra>
// kernel: relation_forward.1
= control target key start
LH: loop header
LB: loop body
LE: loop exit
PB: predicated region body
PF: predicated region fallthrough
CT: control target
= control target key end

     0   :  { %10 = vsyncpa [#allocation4], 0  ;;  %s424_s21 = smov [#allocation3]   ;;  %s618_s0 = inlined_call_operand.vmem [shape: f32[32,4], index: 0, kind: input, shape index: {}]   ;;  %s619_s1 = inlined_call_operand.hbm [shape: f32[8,32], index: 1, kind: input, shape index: {}]   ;;  %s620_s2 = inlined_call_operand.vmem [shape: f32[32,256], index: 2, kind: input, shape index: {}]   ;;  %s621_s3 = inlined_call_operand.vmem [shape: f32[32,4], index: 3, kind: input, shape index: {}]   ;;  %s622_s4 = inlined_call_operand.vmem [shape: f32[1,4], index: 4, kind: input, shape index: {}]   ;;  %s623_s5 = inlined_call_operand.vmem [shape: f32[8,4], index: 5, kind: output, shape index: {}]  }
   0x1   :  { %s18_s20 = sshll.u32 %s619_s1, 4  ;;  %s20_s22 = sshll.u32 %s424_s21, 4  ;;  %s19_s20 = int_to_ptr.hbm [resolvable:$true] %s18_s20  ;;  %s21_s22 = int_to_ptr.vmem [resolvable:$true] %s20_s22 }
   0x2   :  { %23 = dma.hbm_to_vmem [thread:$0]  %s19_s20, 128, %s21_s22, [#allocation4]  }
   0x3   :  { %422 = dma.done.wait [#allocation4], 128  }
   0x4   :  { %423 = vsyncadd [#allocation4], 4294967168  ;;  %vm34_vm0 = vcmask 261120   ;;  %v425_v0 = vmov 0.0   ;;  %vm71_vm1 = vcmask 31744   ;;  %v475_v1 = vld [vmem:[%s618_s0 + $0x18] sm:$0xff] }
   0x5   :  { %38 = vst.msk [vmem:[#allocation2 + $0x18] sm:$0xff] %vm34_vm0, %v425_v0  ;;  %v481_v2 = vld [vmem:[%s618_s0 + $0x10] sm:$0xff]  ;;  %s426_s26 = smov 12   ;;  %v490_v3 = vld [vmem:[%s618_s0 + $0x8] sm:$0xff]  ;;  %s427_s29 = smov 28   ;;  %v67_v4 = vld [vmem:[%s618_s0] sm:$0xff] }
   0x6   :  { %35 = vst.msk [vmem:[#allocation2] sm:$0xff] %vm34_vm0, %v425_v0  ;;  %120 = vrot.lane.b32.xlu0 %v475_v1, %s426_s26  ;;  %118 = vrot.lane.b32.xlu1 %v481_v2, %s426_s26  ;;  %s428_s7 = smov 8   ;;  %s429_s0 = smov 24   ;;  %v206_v5 = vld [vmem:[%s620_s2 + $0x30] sm:$0xff]  ;;  %v207_v6 = vld [vmem:[%s620_s2 + $0x38] sm:$0xff]  ;;  %v199_v13 = vld [vmem:[#allocation3] sm:$0xff] }
   0x7   :  { %36 = vst.msk [vmem:[#allocation2 + $0x8] sm:$0xff] %vm34_vm0, %v425_v0  ;;  %116 = vrot.lane.b32.xlu2 %v490_v3, %s426_s26  ;;  %223 = vmatpush.msra.mxu0 %v206_v5  ;;  %v204_v7 = vld [vmem:[%s620_s2 + $0x20] sm:$0xff]  ;;  %v205_v8 = vld [vmem:[%s620_s2 + $0x28] sm:$0xff]  ;;  %v202_v9 = vld [vmem:[%s620_s2 + $0x10] sm:$0xff]  ;;  %s430_s23 = smov 4   ;;  %s431_s24 = smov 20  }
   0x8   :  { %37 = vst.msk [vmem:[#allocation2 + $0x10] sm:$0xff] %vm34_vm0, %v425_v0  ;;  %243 = vmatpush.msra.mxu1 %v207_v6  ;;  %v203_v10 = vld [vmem:[%s620_s2 + $0x18] sm:$0xff]  ;;  %v200_v11 = vld [vmem:[%s620_s2] sm:$0xff]  ;;  %v201_v12 = vld [vmem:[%s620_s2 + $0x8] sm:$0xff]  ;;  %s432_s2 = smov 16   ;;  %vm126_vm2 = vcmask 130144  }
   0x9   :  { %39 = vst.msk [vmem:[#allocation2 + $0x20] sm:$0xff] %vm34_vm0, %v425_v0  ;;  %224 = vmatpush.msra.mxu0 %v204_v7  ;;  %vm194_vm3 = vcmask 261344   ;;  %vm109_vm4 = vcmask 97344   ;;  %vm177_vm5 = vcmask 228544   ;;  %vm160_vm6 = vcmask 195744   ;;  %v327_v55 = vld [vmem:[%s621_s3 + $0x18] sm:$0xff] }
   0xa   :  { %40 = vst.msk [vmem:[#allocation2 + $0x28] sm:$0xff] %vm34_vm0, %v425_v0  ;;  %244 = vmatpush.msra.mxu1 %v205_v8  ;;  %vm92_vm7 = vcmask 64544   ;;  %vm143_vm8 = vcmask 162944   ;;  %v326_v56 = vld [vmem:[%s621_s3 + $0x10] sm:$0xff] }
   0xb   :  { %41 = vst.msk [vmem:[#allocation2 + $0x30] sm:$0xff] %vm34_vm0, %v425_v0  ;;  %225 = vmatpush.msra.mxu0 %v202_v9 }
   0xc   :  { %75 = vst.msk [vmem:[#allocation2 + $0x18] sm:$0xff] %vm71_vm1, %v475_v1  ;;  %245 = vmatpush.msra.mxu1 %v203_v10 }
   0xd   :  { %42 = vst.msk [vmem:[#allocation2 + $0x38] sm:$0xff] %vm34_vm0, %v425_v0  ;;  %226 = vmatpush.msra.mxu0 %v200_v11 }
   0xe   :  { %43 = vst.msk [vmem:[#allocation2 + $0x40] sm:$0xff] %vm34_vm0, %v425_v0  ;;  %188 = vrot.lane.b32.xlu0 %v475_v1, %s427_s29  ;;  %186 = vrot.lane.b32.xlu1 %v481_v2, %s427_s29 }
   0xf   :  { %44 = vst.msk [vmem:[#allocation2 + $0x48] sm:$0xff] %vm34_vm0, %v425_v0  ;;  %184 = vrot.lane.b32.xlu2 %v490_v3, %s427_s29  ;;  %246 = vmatpush.msra.mxu1 %v201_v12 }
  0x10   :  { %45 = vst.msk [vmem:[#allocation2 + $0x50] sm:$0xff] %vm34_vm0, %v425_v0  ;;  %380 = vmatmul.msk.f32.vlgmr.msra.gmra.mxu0 %vm34_vm0, %v199_v13  ;;  %381 = vmatmul.msk.f32.vlgmr.msra.gmra.mxu1 %vm34_vm0, %v199_v13 }
  0x11   :  { %46 = vst.msk [vmem:[#allocation2 + $0x58] sm:$0xff] %vm34_vm0, %v425_v0  ;;  %347 = vmatpush.msrb.mxu0 %v327_v55 }
  0x12   :  { %47 = vst.msk [vmem:[#allocation2 + $0x60] sm:$0xff] %vm34_vm0, %v425_v0 }
  0x13   :  { %48 = vst.msk [vmem:[#allocation2 + $0x68] sm:$0xff] %vm34_vm0, %v425_v0  ;;  %348 = vmatpush.msrb.mxu0 %v326_v56 }
  0x14   :  { %49 = vst.msk [vmem:[#allocation2 + $0x70] sm:$0xff] %vm34_vm0, %v425_v0 }
  0x15   :  { %50 = vst.msk [vmem:[#allocation2 + $0x78] sm:$0xff] %vm34_vm0, %v425_v0 }
  0x16   :  { %51 = vst.msk [vmem:[#allocation2 + $0x80] sm:$0xff] %vm34_vm0, %v425_v0  ;;  %114 = vrot.lane.b32.xlu0 %v67_v4, %s426_s26  ;;  %182 = vrot.lane.b32.xlu1 %v67_v4, %s427_s29 }
  0x17   :  { %52 = vst.msk [vmem:[#allocation2 + $0x88] sm:$0xff] %vm34_vm0, %v425_v0  ;;  %103 = vrot.lane.b32.xlu2 %v475_v1, %s428_s7 }
  0x18   :  { %53 = vst.msk [vmem:[#allocation2 + $0x90] sm:$0xff] %vm34_vm0, %v425_v0 }
  0x19   :  { %54 = vst.msk [vmem:[#allocation2 + $0x98] sm:$0xff] %vm34_vm0, %v425_v0 }
  0x1a   :  { %55 = vst.msk [vmem:[#allocation2 + $0xa0] sm:$0xff] %vm34_vm0, %v425_v0 }
  0x1b   :  { %56 = vst.msk [vmem:[#allocation2 + $0xa8] sm:$0xff] %vm34_vm0, %v425_v0 }
  0x1c   :  { %57 = vst.msk [vmem:[#allocation2 + $0xb0] sm:$0xff] %vm34_vm0, %v425_v0 }
  0x1d   :  { %58 = vst.msk [vmem:[#allocation2 + $0xb8] sm:$0xff] %vm34_vm0, %v425_v0 }
  0x1e   :  { %59 = vst.msk [vmem:[#allocation2 + $0xc0] sm:$0xff] %vm34_vm0, %v425_v0  ;;  %171 = vrot.lane.b32.xlu0 %v475_v1, %s429_s0  ;;  %101 = vrot.lane.b32.xlu1 %v481_v2, %s428_s7 }
  0x1f   :  { %60 = vst.msk [vmem:[#allocation2 + $0xc8] sm:$0xff] %vm34_vm0, %v425_v0  ;;  %169 = vrot.lane.b32.xlu2 %v481_v2, %s429_s0 }
  0x20   :  { %61 = vst.msk [vmem:[#allocation2 + $0xd0] sm:$0xff] %vm34_vm0, %v425_v0 }
  0x21   :  { %62 = vst.msk [vmem:[#allocation2 + $0xd8] sm:$0xff] %vm34_vm0, %v425_v0 }
  0x22   :  { %63 = vst.msk [vmem:[#allocation2 + $0xe0] sm:$0xff] %vm34_vm0, %v425_v0 }
  0x23   :  { %64 = vst.msk [vmem:[#allocation2 + $0xe8] sm:$0xff] %vm34_vm0, %v425_v0 }
  0x24   :  { %65 = vst.msk [vmem:[#allocation2 + $0xf0] sm:$0xff] %vm34_vm0, %v425_v0 }
  0x25   :  { %66 = vst.msk [vmem:[#allocation2 + $0xf8] sm:$0xff] %vm34_vm0, %v425_v0 }
  0x26   :  { %74 = vst.msk [vmem:[#allocation2 + $0x10] sm:$0xff] %vm71_vm1, %v481_v2  ;;  %99 = vrot.lane.b32.xlu0 %v490_v3, %s428_s7  ;;  %167 = vrot.lane.b32.xlu1 %v490_v3, %s429_s0 }
  0x27   :  { %72 = vst.msk [vmem:[#allocation2] sm:$0xff] %vm71_vm1, %v67_v4  ;;  %97 = vrot.lane.b32.xlu2 %v67_v4, %s428_s7 }
  0x28   :  { %73 = vst.msk [vmem:[#allocation2 + $0x8] sm:$0xff] %vm71_vm1, %v490_v3 }
  0x2e   :  { %165 = vrot.lane.b32.xlu0 %v67_v4, %s429_s0  ;;  %86 = vrot.lane.b32.xlu1 %v475_v1, %s430_s23  ;;  %v251_v6 = vld [vmem:[#allocation2] sm:$0xff] }
  0x2f   :  { %154 = vrot.lane.b32.xlu2 %v475_v1, %s431_s24  ;;  %v252_v5 = vld [vmem:[#allocation2 + $0x8] sm:$0xff] }
  0x36   :  { %84 = vrot.lane.b32.xlu0 %v481_v2, %s430_s23  ;;  %152 = vrot.lane.b32.xlu1 %v481_v2, %s431_s24 }
  0x37   :  { %82 = vrot.lane.b32.xlu2 %v490_v3, %s430_s23 }
  0x3e   :  { %150 = vrot.lane.b32.xlu0 %v490_v3, %s431_s24  ;;  %80 = vrot.lane.b32.xlu1 %v67_v4, %s430_s23 }
  0x3f   :  { %148 = vrot.lane.b32.xlu2 %v67_v4, %s431_s24 }
  0x46   :  { %137 = vrot.lane.b32.xlu0 %v475_v1, %s432_s2  ;;  %135 = vrot.lane.b32.xlu1 %v481_v2, %s432_s2 }
  0x47   :  { %133 = vrot.lane.b32.xlu2 %v490_v3, %s432_s2  ;;  %v254_v3 = vld [vmem:[#allocation2 + $0x18] sm:$0xff] }
  0x4e   :  { %131 = vrot.lane.b32.xlu0 %v67_v4, %s432_s2  ;;  %v253_v4 = vld [vmem:[#allocation2 + $0x10] sm:$0xff] }
  0x61   :  { %v117_v14 = vpop.permute.xlu2 %116 }
  0x62   :  { %128 = vst.msk [vmem:[#allocation2 + $0x68] sm:$0xff] %vm126_vm2, %v117_v14  ;;  %v325_v14 = vld [vmem:[%s621_s3 + $0x8] sm:$0xff] }
  0x63   :  { %349 = vmatpush.msrb.mxu0 %v325_v14 }
  0x69   :  { %v185_v15 = vpop.permute.xlu2 %184  ;;  %v264_v25 = vld [vmem:[#allocation2 + $0x68] sm:$0xff] }
  0x6a   :  { %196 = vst.msk [vmem:[#allocation2 + $0xe8] sm:$0xff] %vm194_vm3, %v185_v15  ;;  %v324_v15 = vld [vmem:[%s621_s3] sm:$0xff] }
  0x6b   :  { %350 = vmatpush.msrb.mxu0 %v324_v15 }
  0x71   :  { %v104_v16 = vpop.permute.xlu2 %103  ;;  %v280_v31 = vld [vmem:[#allocation2 + $0xe8] sm:$0xff] }
  0x72   :  { %113 = vst.msk [vmem:[#allocation2 + $0x58] sm:$0xff] %vm109_vm4, %v104_v16 }
  0x78   :  { %v121_v17 = vpop.permute.xlu0 %120  ;;  %v119_v18 = vpop.permute.xlu1 %118 }
  0x79   :  { %130 = vst.msk [vmem:[#allocation2 + $0x78] sm:$0xff] %vm126_vm2, %v121_v17  ;;  %v170_v19 = vpop.permute.xlu2 %169  ;;  %v262_v35 = vld [vmem:[#allocation2 + $0x58] sm:$0xff] }
  0x7a   :  { %129 = vst.msk [vmem:[#allocation2 + $0x70] sm:$0xff] %vm126_vm2, %v119_v18 }
  0x7b   :  { %180 = vst.msk [vmem:[#allocation2 + $0xd0] sm:$0xff] %vm177_vm5, %v170_v19 }
  0x80   :  { %v189_v20 = vpop.permute.xlu0 %188  ;;  %v266_v21 = vld [vmem:[#allocation2 + $0x78] sm:$0xff]  ;;  %v187_v22 = vpop.permute.xlu1 %186 }
  0x81   :  { %198 = vst.msk [vmem:[#allocation2 + $0xf8] sm:$0xff] %vm194_vm3, %v189_v20  ;;  %283 = vmatpush.msra.mxu2 %v266_v21  ;;  %v265_v23 = vld [vmem:[#allocation2 + $0x70] sm:$0xff]  ;;  %v98_v24 = vpop.permute.xlu2 %97  ;;  %v393_v20 = vld [vmem:[%s622_s4] ss:$0 sm:$0xff] }
  0x82   :  { %197 = vst.msk [vmem:[#allocation2 + $0xf0] sm:$0xff] %vm194_vm3, %v187_v22  ;;  %v277_v41 = vld [vmem:[#allocation2 + $0xd0] sm:$0xff] }
  0x83   :  { %284 = vmatpush.msra.mxu2 %v265_v23  ;;  %110 = vst.msk [vmem:[#allocation2 + $0x40] sm:$0xff] %vm109_vm4, %v98_v24 }
  0x85   :  { %285 = vmatpush.msra.mxu2 %v264_v25 }
  0x88   :  { %v115_v26 = vpop.permute.xlu0 %114  ;;  %v282_v27 = vld [vmem:[#allocation2 + $0xf8] sm:$0xff]  ;;  %v183_v28 = vpop.permute.xlu1 %182 }
  0x89   :  { %127 = vst.msk [vmem:[#allocation2 + $0x60] sm:$0xff] %vm126_vm2, %v115_v26  ;;  %303 = vmatpush.msra.mxu3 %v282_v27  ;;  %v281_v29 = vld [vmem:[#allocation2 + $0xf0] sm:$0xff]  ;;  %v155_v30 = vpop.permute.xlu2 %154 }
  0x8a   :  { %195 = vst.msk [vmem:[#allocation2 + $0xe0] sm:$0xff] %vm194_vm3, %v183_v28  ;;  %v259_v47 = vld [vmem:[#allocation2 + $0x40] sm:$0xff] }
  0x8b   :  { %304 = vmatpush.msra.mxu3 %v281_v29  ;;  %164 = vst.msk [vmem:[#allocation2 + $0xb8] sm:$0xff] %vm160_vm6, %v155_v30 }
  0x8d   :  { %305 = vmatpush.msra.mxu3 %v280_v31  ;;  %v228_v9 = vpop.f32.mrf.mxu0  ;;  %v248_v12 = vpop.f32.mrf.mxu1 }
  0x90   :  { %v172_v32 = vpop.permute.xlu0 %171  ;;  %v263_v33 = vld [vmem:[#allocation2 + $0x60] sm:$0xff]  ;;  %v102_v34 = vpop.permute.xlu1 %101 }
  0x91   :  { %181 = vst.msk [vmem:[#allocation2 + $0xd8] sm:$0xff] %vm177_vm5, %v172_v32  ;;  %286 = vmatpush.msra.mxu2 %v263_v33  ;;  %v279_v36 = vld [vmem:[#allocation2 + $0xe0] sm:$0xff]  ;;  %v83_v37 = vpop.permute.xlu2 %82 }
  0x92   :  { %112 = vst.msk [vmem:[#allocation2 + $0x50] sm:$0xff] %vm109_vm4, %v102_v34  ;;  %306 = vmatpush.msra.mxu3 %v279_v36  ;;  %v274_v53 = vld [vmem:[#allocation2 + $0xb8] sm:$0xff] }
  0x93   :  { %287 = vmatpush.msra.mxu2 %v262_v35  ;;  %94 = vst.msk [vmem:[#allocation2 + $0x28] sm:$0xff] %vm92_vm7, %v83_v37 }
  0x98   :  { %v100_v38 = vpop.permute.xlu0 %99  ;;  %v278_v39 = vld [vmem:[#allocation2 + $0xd8] sm:$0xff]  ;;  %v168_v40 = vpop.permute.xlu1 %167 }
  0x99   :  { %111 = vst.msk [vmem:[#allocation2 + $0x48] sm:$0xff] %vm109_vm4, %v100_v38  ;;  %307 = vmatpush.msra.mxu3 %v278_v39  ;;  %v261_v42 = vld [vmem:[#allocation2 + $0x50] sm:$0xff]  ;;  %v149_v43 = vpop.permute.xlu2 %148 }
  0x9a   :  { %179 = vst.msk [vmem:[#allocation2 + $0xc8] sm:$0xff] %vm177_vm5, %v168_v40  ;;  %288 = vmatpush.msra.mxu2 %v261_v42  ;;  %v256_v60 = vld [vmem:[#allocation2 + $0x28] sm:$0xff] }
  0x9b   :  { %308 = vmatpush.msra.mxu3 %v277_v41  ;;  %161 = vst.msk [vmem:[#allocation2 + $0xa0] sm:$0xff] %vm160_vm6, %v149_v43 }
  0xa0   :  { %v166_v44 = vpop.permute.xlu0 %165  ;;  %v260_v45 = vld [vmem:[#allocation2 + $0x48] sm:$0xff]  ;;  %v87_v46 = vpop.permute.xlu1 %86 }
  0xa1   :  { %178 = vst.msk [vmem:[#allocation2 + $0xc0] sm:$0xff] %vm177_vm5, %v166_v44  ;;  %289 = vmatpush.msra.mxu2 %v260_v45  ;;  %v276_v48 = vld [vmem:[#allocation2 + $0xc8] sm:$0xff]  ;;  %v134_v49 = vpop.permute.xlu2 %133 }
  0xa2   :  { %96 = vst.msk [vmem:[#allocation2 + $0x38] sm:$0xff] %vm92_vm7, %v87_v46  ;;  %309 = vmatpush.msra.mxu3 %v276_v48  ;;  %v271_v1 = vld [vmem:[#allocation2 + $0xa0] sm:$0xff] }
  0xa3   :  { %290 = vmatpush.msra.mxu2 %v259_v47  ;;  %145 = vst.msk [vmem:[#allocation2 + $0x88] sm:$0xff] %vm143_vm8, %v134_v49 }
  0xa8   :  { %v85_v50 = vpop.permute.xlu0 %84  ;;  %v275_v51 = vld [vmem:[#allocation2 + $0xc0] sm:$0xff]  ;;  %v153_v52 = vpop.permute.xlu1 %152 }
  0xa9   :  { %95 = vst.msk [vmem:[#allocation2 + $0x30] sm:$0xff] %vm92_vm7, %v85_v50  ;;  %310 = vmatpush.msra.mxu3 %v275_v51  ;;  %v258_v54 = vld [vmem:[#allocation2 + $0x38] sm:$0xff] }
  0xaa   :  { %163 = vst.msk [vmem:[#allocation2 + $0xb0] sm:$0xff] %vm160_vm6, %v153_v52  ;;  %291 = vmatpush.msra.mxu2 %v258_v54  ;;  %v268_v11 = vld [vmem:[#allocation2 + $0x88] sm:$0xff] }
  0xab   :  { %311 = vmatpush.msra.mxu3 %v274_v53 }
  0xb0   :  { %v151_v57 = vpop.permute.xlu0 %150  ;;  %v257_v58 = vld [vmem:[#allocation2 + $0x30] sm:$0xff]  ;;  %v81_v59 = vpop.permute.xlu1 %80 }
  0xb1   :  { %162 = vst.msk [vmem:[#allocation2 + $0xa8] sm:$0xff] %vm160_vm6, %v151_v57  ;;  %292 = vmatpush.msra.mxu2 %v257_v58  ;;  %v273_v61 = vld [vmem:[#allocation2 + $0xb0] sm:$0xff] }
  0xb2   :  { %93 = vst.msk [vmem:[#allocation2 + $0x20] sm:$0xff] %vm92_vm7, %v81_v59  ;;  %312 = vmatpush.msra.mxu3 %v273_v61 }
  0xb3   :  { %293 = vmatpush.msra.mxu2 %v256_v60 }
  0xb8   :  { %v138_v62 = vpop.permute.xlu0 %137  ;;  %v272_v63 = vld [vmem:[#allocation2 + $0xa8] sm:$0xff]  ;;  %v136_v0 = vpop.permute.xlu1 %135 }
  0xb9   :  { %147 = vst.msk [vmem:[#allocation2 + $0x98] sm:$0xff] %vm143_vm8, %v138_v62  ;;  %313 = vmatpush.msra.mxu3 %v272_v63  ;;  %v255_v2 = vld [vmem:[#allocation2 + $0x20] sm:$0xff] }
  0xba   :  { %146 = vst.msk [vmem:[#allocation2 + $0x90] sm:$0xff] %vm143_vm8, %v136_v0  ;;  %294 = vmatpush.msra.mxu2 %v255_v2 }
  0xbb   :  { %314 = vmatpush.msra.mxu3 %v271_v1 }
  0xbc   :  { %295 = vmatpush.msra.mxu2 %v254_v3 }
  0xbe   :  { %296 = vmatpush.msra.mxu2 %v253_v4 }
  0xc0   :  { %v132_v7 = vpop.permute.xlu0 %131  ;;  %v270_v8 = vld [vmem:[#allocation2 + $0x98] sm:$0xff]  ;;  %297 = vmatpush.msra.mxu2 %v252_v5 }
  0xc1   :  { %144 = vst.msk [vmem:[#allocation2 + $0x80] sm:$0xff] %vm143_vm8, %v132_v7  ;;  %315 = vmatpush.msra.mxu3 %v270_v8  ;;  %v269_v10 = vld [vmem:[#allocation2 + $0x90] sm:$0xff] }
  0xc2   :  { %298 = vmatpush.msra.mxu2 %v251_v6 }
  0xc3   :  { %316 = vmatpush.msra.mxu3 %v269_v10  ;;  %299 = vmatmul.f32.vlgmr.msra.gmra.mxu2 %v228_v9 }
  0xc5   :  { %317 = vmatpush.msra.mxu3 %v268_v11 }
  0xc8   :  { %v267_v13 = vld [vmem:[#allocation2 + $0x80] sm:$0xff] }
  0xc9   :  { %318 = vmatpush.msra.mxu3 %v267_v13 }
  0xca   :  { %319 = vmatmul.f32.vlgmr.msra.gmra.mxu3 %v248_v12 }
 0x146   :  { %v300_v16 = vpop.f32.mrf.mxu2 }
 0x14d   :  { %v320_v17 = vpop.f32.mrf.mxu3 }
 0x14e   :  { %v321_v18 = vadd.f32 %v320_v17, %v300_v16 }
 0x150   :  { %v323_v19 = vmax.f32 %v321_v18, 0.0 }
 0x152   :  { %382 = vmatmul.msk.f32.vlgmr.msrb.gmra.mxu0 %vm34_vm0, %v323_v19 }
 0x1cf   :  { %v352_v21 = vpop.f32.mrf.mxu0 }
 0x1d0   :  { %v353_v22 = vadd.f32 %v393_v20, %v352_v21 }
 0x1d2   :  { %v383_v23 = vmul.f32 -1.442695, %v353_v22 }
 0x1d4   :  { %394 = vpow2.f32 %v383_v23 }
 0x1da   :  { %v395_v24 = vpop.eup %394 }
 0x1db   :  { %v358_v25 = vadd.f32 1.0, %v395_v24 }
 0x1dd   :  { %396 = vrcp.f32 %v358_v25  ;;  %v370_v29 = vand.u32 2147483648, %v358_v25  ;;  %v368_v31 = vand.u32 2147483647, %v358_v25  ;;  %vm364_vm10 = vweird.f32 %v358_v25 }
 0x1df   :  { %v371_v33 = vor.u32 1.1754944e-38, %v370_v29  ;;  %vm369_vm12 = vcmp.eq.f32.partialorder %v368_v31, 8.507059e+37 }
 0x1e3   :  { %v397_v26 = vpop.eup %396 }
 0x1e4   :  { %v360_v27 = vmul.f32 %v397_v26, %v358_v25  ;;  %vm365_vm9 = vweird.f32 %v397_v26 }
 0x1e5   :  { %vm366_vm11 = vmor %vm364_vm10, %vm365_vm9 }
 0x1e6   :  { %v361_v28 = vsub.f32 1.0, %v360_v27 }
 0x1e8   :  { %v362_v30 = vmul.f32 %v397_v26, %v361_v28 }
 0x1ea   :  { %v363_v32 = vadd.f32 %v397_v26, %v362_v30 }
 0x1ec   :  { %v367_v34 = vsel %vm366_vm11, %v397_v26, %v363_v32 }
 0x1ed   :  { %v372_v35 = vsel %vm369_vm12, %v371_v33, %v367_v34 }
 0x1ee   :  { %374 = vst.msk [vmem:[%s623_s5] sm:$0xff] %vm71_vm1, %v372_v35 }
 0x1ef   :  { %379 = vsyncpa [#allocation4], 1 }

</bundles_post_ra>
